<compile_context>
chip_gen: v7x
topology: tpu7x:2x2x1
jax: 0.10.0
libtpu: 0.0.40
codegen_flags: <defaults>
</compile_context>

<pallas_src>
import numpy as np
import jax
import jax.numpy as jnp
from jax.experimental import pallas as pl
from jax.experimental.pallas import tpu as pltpu


# ----------------------------- Pallas kernel ------------------------------ #
def _make_kernel(D, L, tile_w):
    """Kernel for one tile of G decoder examples = tile_w = G*L lanes.
    Encoder columns and decoder columns coincide: lane index = example*L + pos
    for the decoder view, and = encoder-example index for the encoder view."""

    def kernel(x_ref, e1_ref, e2_ref, e3_ref, e4_ref,
               d1_ref, d2_ref, d3_ref, d4_ref, out_ref):
        f32 = jnp.float32
        dot = lambda a, b: jnp.dot(a, b, preferred_element_type=f32)
        relu = lambda v: jnp.maximum(v, 0.0)

        # ------------------------------ encode ----------------------------- #
        # Positions-on-sublanes: x is (D*L, tile_w), rows = (channel, pos),
        # lanes = encoder examples.  Every layer is one dense matmul; the k=3
        # 'same' conv boundary handling lives in the static block matrix e3.
        x = x_ref[...]                                       # (D*L, tile_w)
        e1 = e1_ref[...]                                     # (16L, D*L + 1)
        h = relu(dot(e1[:, :D * L], x) + e1[:, D * L:])      # (16L, tile_w)
        e2 = e2_ref[...]                                     # (8L, 16L + 1)
        h = relu(dot(e2[:, :16 * L], h) + e2[:, 16 * L:])    # (8L, tile_w)
        e3 = e3_ref[...]                                     # (4L, 8L + 1)
        h = relu(dot(e3[:, :8 * L], h) + e3[:, 8 * L:])      # (4L, tile_w)
        # Linear(4*L -> 1): rows of h are already (c*L + l) = torch's
        # view(-1, 4*L) feature order, so this is a plain (1, 4L) dot.
        e4 = e4_ref[...]                                     # (1, 4L + 1)
        code = dot(e4[:, :4 * L], h) + e4[:, 4 * L:]         # (1, tile_w)

        # ------------------------------ decode ----------------------------- #
        # torch: code.view(-1, 1, L) -> decoder lanes are (example, position).
        # Tiles always start at an example boundary (tile_w % L == 0), so the
        # in-tile lane index mod L is the position inside each example.
        pos = jax.lax.broadcasted_iota(jnp.int32, (1, tile_w), 1) % L
        nf = (pos != 0).astype(f32)          # zero where there is no left nbr
        nl = (pos != (L - 1)).astype(f32)    # zero where there is no right nbr

        def taps(v):
            prev = pltpu.roll(v, shift=1, axis=1) * nf            # v[l-1]
            nxt = pltpu.roll(v, shift=tile_w - 1, axis=1) * nl    # v[l+1]
            return prev, nxt

        # decode_layer1 (1->4, k=3 'same'): pure outer-product -> VPU
        # broadcast multiply-adds, no MXU round trips on the serial chain.
        d1 = d1_ref[...]                                     # (4, 4)
        c_prev, c_next = taps(code)
        g = relu(d1[:, 0:1] * c_prev + d1[:, 1:2] * code
                 + d1[:, 2:3] * c_next + d1[:, 3:4])          # (4, tile_w)

        # decode_layer2 (4->8, k=3 'same'): fuse the three taps into one
        # (8, 12) x (12, tile_w) matmul (weights already contiguous in d2).
        g_prev, g_next = taps(g)
        g3 = jnp.concatenate([g_prev, g, g_next], axis=0)     # (12, tile_w)
        d2 = d2_ref[...]                                      # (8, 13)
        g = relu(dot(d2[:, :12], g3) + d2[:, 12:])            # (8, tile_w)

        d3 = d3_ref[...]                                      # (16, 9)
        g = relu(dot(d3[:, :8], g) + d3[:, 8:])               # (16, tile_w)
        d4 = d4_ref[...]                                      # (D, 17)
        out_ref[...] = dot(d4[:, :16], g) + d4[:, 16:]        # (D, tile_w)

    return kernel


# --------------------------- small host-side helpers ----------------------- #
def _expand_k1(w, L):
    """Conv1d(k=1) weight (Co, Ci, 1) -> block-diagonal (Co*L, Ci*L) acting on
    a positions-on-sublanes slab (rows = channel*L + position)."""
    co, ci = w.shape[0], w.shape[1]
    eye = jnp.eye(L, dtype=jnp.float32)
    return jnp.einsum('oi,lm->olim', jnp.asarray(w[:, :, 0], jnp.float32),
                      eye).reshape(co * L, ci * L)


def _expand_k3_same(w, L):
    """Conv1d(k=3, padding='same') weight (Co, Ci, 3) -> (Co*L, Ci*L) with the
    zero-padding boundary conditions baked into the static matrix."""
    co, ci = w.shape[0], w.shape[1]
    out = jnp.zeros((co, L, ci, L), jnp.float32)
    for kk in range(3):                       # tap kk corresponds to offset kk-1
        shift = jnp.eye(L, k=kk - 1, dtype=jnp.float32)   # [l, l'] = 1 iff l'=l+kk-1
        out = out + jnp.einsum('oi,lm->olim',
                               jnp.asarray(w[:, :, kk], jnp.float32), shift)
    return out.reshape(co * L, ci * L)


def _rep_bias(b, L):
    """Bias (Co,) -> column (Co*L, 1) matching the (channel, position) rows."""
    return jnp.repeat(jnp.asarray(b, jnp.float32), L).reshape(-1, 1)


def _pick_examples_per_tile(n_examples, L, max_lanes=2048, min_tiles=2):
    """Largest divisor G of the decoder-example count whose tile width G*L is
    lane-dense (multiple of 128) and <= max_lanes, preferring choices that
    leave >= min_tiles grid steps (so v7x can split the parallel axis across
    its two TensorCores).  Falls back to one full-width tile for tiny sizes."""
    divs = [g for g in range(1, n_examples + 1) if n_examples % g == 0]
    dense = [g for g in divs if (g * L) % 128 == 0 and g * L <= max_lanes]
    pref = [g for g in dense if n_examples // g >= min_tiles]
    if pref:
        return max(pref)
    if dense:
        return max(dense)
    return n_examples


# ------------------------------ forward wrapper ----------------------------- #
def autoencoder_forward_pallas(x, params, examples_per_tile=None):
    B, D, L = x.shape
    assert B % L == 0, "torch's decode does view(-1, 1, input_len): B % L must be 0"
    B2 = B // L                     # decoder examples

    G = (_pick_examples_per_tile(B2, L)
         if examples_per_tile is None else examples_per_tile)
    assert B2 % G == 0, "examples_per_tile must divide the decoder batch"
    tile_w = G * L                  # lanes per grid step (enc & dec coincide)
    num_tiles = B2 // G
    # Tiles must start at decoder-example boundaries (they do: tile_w = G*L)
    # and be lane-dense unless there is a single full-width tile.
    assert tile_w % L == 0
    assert num_tiles == 1 or tile_w % 128 == 0, \
        "tile width must be a multiple of 128 when there is more than one tile"

    f32 = jnp.float32
    # NCL -> positions-on-sublanes (D*L, B): row = channel*L + position,
    # column = example index.  Cheap host-side XLA relayout.
    x_pos = jnp.transpose(x, (1, 2, 0)).reshape(D * L, B).astype(f32)

    col = lambda v: jnp.asarray(v, f32).reshape(-1, 1)
    cat = lambda *arrs: jnp.concatenate([jnp.asarray(a, f32) for a in arrs], axis=1)

    # Encoder packs: [block-expanded W | per-row bias].
    e1_p = cat(_expand_k1(params['e1_w'], L), _rep_bias(params['e1_b'], L))      # (16L, D*L+1)
    e2_p = cat(_expand_k1(params['e2_w'], L), _rep_bias(params['e2_b'], L))      # (8L, 16L+1)
    e3_p = cat(_expand_k3_same(params['e3_w'], L), _rep_bias(params['e3_b'], L))  # (4L, 8L+1)
    e4_p = cat(jnp.asarray(params['e4_w'], f32).reshape(1, 4 * L),
               jnp.asarray(params['e4_b'], f32).reshape(1, 1))                   # (1, 4L+1)

    # Decoder packs: [w_tap-1 | w_tap0 | w_tap+1 | b] (or [W | b] for k=1).
    d1w, d2w = params['d1_w'], params['d2_w']
    d1_p = cat(d1w[:, :, 0], d1w[:, :, 1], d1w[:, :, 2], col(params['d1_b']))    # (4, 4)
    d2_p = cat(d2w[:, :, 0], d2w[:, :, 1], d2w[:, :, 2], col(params['d2_b']))    # (8, 13)
    d3_p = cat(params['d3_w'][:, :, 0], col(params['d3_b']))                      # (16, 9)
    d4_p = cat(params['d4_w'][:, :, 0], col(params['d4_b']))                      # (D, 17)

    weights = [e1_p, e2_p, e3_p, e4_p, d1_p, d2_p, d3_p, d4_p]
    const = lambda i: (0, 0)
    in_specs = ([pl.BlockSpec((D * L, tile_w), lambda i: (0, i))]
                + [pl.BlockSpec(w.shape, const) for w in weights])

    out_flat = pl.pallas_call(
        _make_kernel(D, L, tile_w),
        out_shape=jax.ShapeDtypeStruct((D, B), f32),
        grid=(num_tiles,),
        in_specs=in_specs,
        out_specs=pl.BlockSpec((D, tile_w), lambda i: (0, i)),
        compiler_params=pltpu.CompilerParams(
            dimension_semantics=("parallel",),
            vmem_limit_bytes=32 * 1024 * 1024),
    )(x_pos, *weights)

    # (D, B2*L) -> NCL (B2, D, L)
    return out_flat.reshape(D, B2, L).transpose(1, 0, 2)


# ------------------------- deterministic parameter init --------------------- #
def init_params(key, input_dim, input_len):
    def conv(k, out_c, in_c, ks):
        kw, kb = jax.random.split(k)
        s = 1.0 / np.sqrt(in_c * ks)
        return (jax.random.uniform(kw, (out_c, in_c, ks), jnp.float32, -s, s),
                jax.random.uniform(kb, (out_c,), jnp.float32, -s, s))

    def linear(k, out_f, in_f):
        kw, kb = jax.random.split(k)
        s = 1.0 / np.sqrt(in_f)
        return (jax.random.uniform(kw, (out_f, in_f), jnp.float32, -s, s),
                jax.random.uniform(kb, (out_f,), jnp.float32, -s, s))

    keys = jax.random.split(key, 9)
    p = {}
    p['e1_w'], p['e1_b'] = conv(keys[0], 16, input_dim, 1)
    p['e2_w'], p['e2_b'] = conv(keys[1], 8, 16, 1)
    p['e3_w'], p['e3_b'] = conv(keys[2], 4, 8, 3)
    p['e4_w'], p['e4_b'] = linear(keys[3], 1, 4 * input_len)
    p['d1_w'], p['d1_b'] = conv(keys[4], 4, 1, 3)
    p['d2_w'], p['d2_b'] = conv(keys[5], 8, 4, 3)
    p['d3_w'], p['d3_b'] = conv(keys[6], 16, 8, 1)
    p['d4_w'], p['d4_b'] = conv(keys[7], input_dim, 16, 1)
    # estimator_layer exists in __init__ but is not used by forward()
    p['est_w'], p['est_b'] = linear(keys[8], 1, input_len)
    return p


# ------------------------------- pure-JAX reference ------------------------- #
def _conv1d_ref(x, w, b, padding):
    y = jax.lax.conv_general_dilated(
        x, w, window_strides=(1,), padding=padding,
        dimension_numbers=('NCH', 'OIH', 'NCH'))
    return y + b[None, :, None]


def autoencoder_forward_ref(x, p):
    B, D, L = x.shape
    h = jax.nn.relu(_conv1d_ref(x, p['e1_w'], p['e1_b'], 'VALID'))
    h = jax.nn.relu(_conv1d_ref(h, p['e2_w'], p['e2_b'], 'VALID'))
    h = jax.nn.relu(_conv1d_ref(h, p['e3_w'], p['e3_b'], 'SAME'))
    h = h.reshape(-1, 4 * L)
    code = h @ p['e4_w'].T + p['e4_b']          # (B, 1)
    g = code.reshape(-1, 1, L)                  # (B//L, 1, L) — as in torch
    g = jax.nn.relu(_conv1d_ref(g, p['d1_w'], p['d1_b'], 'SAME'))
    g = jax.nn.relu(_conv1d_ref(g, p['d2_w'], p['d2_b'], 'SAME'))
    g = jax.nn.relu(_conv1d_ref(g, p['d3_w'], p['d3_b'], 'VALID'))
    g = _conv1d_ref(g, p['d4_w'], p['d4_b'], 'VALID')
    return g


if __name__ == "__main__":
    D, L = 4, 8          # input_dim, input_len
    B = 256              # divisible by L (required by torch's view(-1, 1, L));
                         # gives 32 decoder examples -> 2 lane-dense 128-lane
                         # tiles so the parallel grid axis has >= 2 steps.

    key = jax.random.PRNGKey(0)
    k_params, k_x = jax.random.split(key)
    params = init_params(k_params, D, L)
    x = jax.random.normal(k_x, (B, D, L), jnp.float32)

    out = jax.block_until_ready(autoencoder_forward_pallas(x, params))
    ref = autoencoder_forward_ref(x, params)

    assert out.shape == (B // L, D, L), out.shape
    np.testing.assert_allclose(np.asarray(out), np.asarray(ref), rtol=1e-2, atol=1e-3)
    print("KERNEL_OK")
</pallas_src>

<mosaic_0001>
module attributes {stable_mosaic.version = 11 : i64} {
  func.func @kernel(%arg0: i32, %arg1: memref<32x128xf32, #tpu.memory_space<vmem>>, %arg2: memref<128x33xf32, #tpu.memory_space<vmem>>, %arg3: memref<64x129xf32, #tpu.memory_space<vmem>>, %arg4: memref<32x65xf32, #tpu.memory_space<vmem>>, %arg5: memref<1x33xf32, #tpu.memory_space<vmem>>, %arg6: memref<4x4xf32, #tpu.memory_space<vmem>>, %arg7: memref<8x13xf32, #tpu.memory_space<vmem>>, %arg8: memref<16x9xf32, #tpu.memory_space<vmem>>, %arg9: memref<4x17xf32, #tpu.memory_space<vmem>>, %arg10: memref<4x128xf32, #tpu.memory_space<vmem>>) attributes {dimension_semantics = [#tpu.dimension_semantics<parallel>], iteration_bounds = array<i64: 2>, scalar_prefetch = 0 : i64, scratch_operands = 0 : i64, tpu.core_type = #tpu.core_type<tc>, window_params = [{transform_indices = @transform_0, window_bounds = array<i64: 32, 128>}, {pipeline_mode = #tpu.pipeline_mode<synchronous>, transform_indices = @transform_1, window_bounds = array<i64: 128, 33>}, {pipeline_mode = #tpu.pipeline_mode<synchronous>, transform_indices = @transform_2, window_bounds = array<i64: 64, 129>}, {pipeline_mode = #tpu.pipeline_mode<synchronous>, transform_indices = @transform_3, window_bounds = array<i64: 32, 65>}, {pipeline_mode = #tpu.pipeline_mode<synchronous>, transform_indices = @transform_4, window_bounds = array<i64: 1, 33>}, {pipeline_mode = #tpu.pipeline_mode<synchronous>, transform_indices = @transform_5, window_bounds = array<i64: 4, 4>}, {pipeline_mode = #tpu.pipeline_mode<synchronous>, transform_indices = @transform_6, window_bounds = array<i64: 8, 13>}, {pipeline_mode = #tpu.pipeline_mode<synchronous>, transform_indices = @transform_7, window_bounds = array<i64: 16, 9>}, {pipeline_mode = #tpu.pipeline_mode<synchronous>, transform_indices = @transform_8, window_bounds = array<i64: 4, 17>}, {transform_indices = @transform_9, window_bounds = array<i64: 4, 128>}]} {
    %c0 = arith.constant 0 : index
    %c0_0 = arith.constant 0 : index
    %0 = vector.load %arg1[%c0, %c0_0] : memref<32x128xf32, #tpu.memory_space<vmem>>, vector<32x128xf32>
    %c0_1 = arith.constant 0 : index
    %c0_2 = arith.constant 0 : index
    %1 = vector.load %arg2[%c0_1, %c0_2] : memref<128x33xf32, #tpu.memory_space<vmem>>, vector<128x33xf32>
    %2 = vector.extract_strided_slice %1 {offsets = [0, 0], sizes = [128, 32], strides = [1, 1]} : vector<128x33xf32> to vector<128x32xf32>
    %cst = arith.constant dense<0.000000e+00> : vector<128x128xf32>
    %3 = tpu.matmul %2, %0, %cst {dimension_numbers = #tpu.dot_dimension_numbers<[1], [0], [0], [1], [0, 0, 1, 1], [], []>} : vector<128x32xf32>, vector<32x128xf32>, vector<128x128xf32> -> vector<128x128xf32>
    %4 = vector.extract_strided_slice %1 {offsets = [0, 32], sizes = [128, 1], strides = [1, 1]} : vector<128x33xf32> to vector<128x1xf32>
    %5 = vector.broadcast %4 : vector<128x1xf32> to vector<128x128xf32>
    %6 = arith.addf %3, %5 : vector<128x128xf32>
    %cst_3 = arith.constant 0.000000e+00 : f32
    %7 = vector.broadcast %cst_3 : f32 to vector<128x128xf32>
    %8 = arith.maximumf %6, %7 : vector<128x128xf32>
    %c0_4 = arith.constant 0 : index
    %c0_5 = arith.constant 0 : index
    %9 = vector.load %arg3[%c0_4, %c0_5] : memref<64x129xf32, #tpu.memory_space<vmem>>, vector<64x129xf32>
    %10 = vector.extract_strided_slice %9 {offsets = [0, 0], sizes = [64, 128], strides = [1, 1]} : vector<64x129xf32> to vector<64x128xf32>
    %cst_6 = arith.constant dense<0.000000e+00> : vector<64x128xf32>
    %11 = tpu.matmul %10, %8, %cst_6 {dimension_numbers = #tpu.dot_dimension_numbers<[1], [0], [0], [1], [0, 0, 1, 1], [], []>} : vector<64x128xf32>, vector<128x128xf32>, vector<64x128xf32> -> vector<64x128xf32>
    %12 = vector.extract_strided_slice %9 {offsets = [0, 128], sizes = [64, 1], strides = [1, 1]} : vector<64x129xf32> to vector<64x1xf32>
    %13 = vector.broadcast %12 : vector<64x1xf32> to vector<64x128xf32>
    %14 = arith.addf %11, %13 : vector<64x128xf32>
    %cst_7 = arith.constant 0.000000e+00 : f32
    %15 = vector.broadcast %cst_7 : f32 to vector<64x128xf32>
    %16 = arith.maximumf %14, %15 : vector<64x128xf32>
    %c0_8 = arith.constant 0 : index
    %c0_9 = arith.constant 0 : index
    %17 = vector.load %arg4[%c0_8, %c0_9] : memref<32x65xf32, #tpu.memory_space<vmem>>, vector<32x65xf32>
    %18 = vector.extract_strided_slice %17 {offsets = [0, 0], sizes = [32, 64], strides = [1, 1]} : vector<32x65xf32> to vector<32x64xf32>
    %cst_10 = arith.constant dense<0.000000e+00> : vector<32x128xf32>
    %19 = tpu.matmul %18, %16, %cst_10 {dimension_numbers = #tpu.dot_dimension_numbers<[1], [0], [0], [1], [0, 0, 1, 1], [], []>} : vector<32x64xf32>, vector<64x128xf32>, vector<32x128xf32> -> vector<32x128xf32>
    %20 = vector.extract_strided_slice %17 {offsets = [0, 64], sizes = [32, 1], strides = [1, 1]} : vector<32x65xf32> to vector<32x1xf32>
    %21 = vector.broadcast %20 : vector<32x1xf32> to vector<32x128xf32>
    %22 = arith.addf %19, %21 : vector<32x128xf32>
    %cst_11 = arith.constant 0.000000e+00 : f32
    %23 = vector.broadcast %cst_11 : f32 to vector<32x128xf32>
    %24 = arith.maximumf %22, %23 : vector<32x128xf32>
    %c0_12 = arith.constant 0 : index
    %c0_13 = arith.constant 0 : index
    %25 = vector.load %arg5[%c0_12, %c0_13] : memref<1x33xf32, #tpu.memory_space<vmem>>, vector<1x33xf32>
    %26 = vector.extract_strided_slice %25 {offsets = [0, 0], sizes = [1, 32], strides = [1, 1]} : vector<1x33xf32> to vector<1x32xf32>
    %cst_14 = arith.constant dense<0.000000e+00> : vector<1x128xf32>
    %27 = tpu.matmul %26, %24, %cst_14 {dimension_numbers = #tpu.dot_dimension_numbers<[1], [0], [0], [1], [0, 0, 1, 1], [], []>} : vector<1x32xf32>, vector<32x128xf32>, vector<1x128xf32> -> vector<1x128xf32>
    %28 = vector.extract_strided_slice %25 {offsets = [0, 32], sizes = [1, 1], strides = [1, 1]} : vector<1x33xf32> to vector<1x1xf32>
    %29 = vector.broadcast %28 : vector<1x1xf32> to vector<1x128xf32>
    %30 = arith.addf %27, %29 : vector<1x128xf32>
    %31 = tpu.iota {dimensions = array<i32: 1>} : vector<1x128xi32>
    %c8_i32 = arith.constant 8 : i32
    %c0_i32 = arith.constant 0 : i32
    %32 = arith.cmpi eq, %c8_i32, %c0_i32 : i32
    %c1_i32 = arith.constant 1 : i32
    %33 = arith.select %32, %c1_i32, %c8_i32 : i32
    %34 = vector.broadcast %33 : i32 to vector<1x128xi32>
    %35 = arith.remsi %31, %34 : vector<1x128xi32>
    %c0_i32_15 = arith.constant 0 : i32
    %36 = vector.broadcast %c0_i32_15 : i32 to vector<1x128xi32>
    %37 = arith.cmpi ne, %35, %36 : vector<1x128xi32>
    %c0_i32_16 = arith.constant 0 : i32
    %38 = vector.broadcast %c0_i32_16 : i32 to vector<1x128xi32>
    %39 = arith.cmpi slt, %35, %38 : vector<1x128xi32>
    %c0_i32_17 = arith.constant 0 : i32
    %40 = arith.cmpi slt, %33, %c0_i32_17 : i32
    %41 = vector.broadcast %40 : i1 to vector<1x128xi1>
    %42 = vector.broadcast %41 : vector<1x128xi1> to vector<1x128xi1>
    %43 = arith.xori %39, %42 : vector<1x128xi1>
    %44 = arith.andi %43, %37 : vector<1x128xi1>
    %45 = vector.broadcast %33 : i32 to vector<1x128xi32>
    %46 = arith.addi %35, %45 : vector<1x128xi32>
    %47 = arith.select %44, %46, %35 : vector<1x128xi1>, vector<1x128xi32>
    %c0_i32_18 = arith.constant 0 : i32
    %48 = vector.broadcast %c0_i32_18 : i32 to vector<1x128xi32>
    %49 = arith.cmpi ne, %47, %48 : vector<1x128xi32>
    %50 = arith.extui %49 : vector<1x128xi1> to vector<1x128xi32>
    %51 = arith.sitofp %50 : vector<1x128xi32> to vector<1x128xf32>
    %c7_i32 = arith.constant 7 : i32
    %52 = vector.broadcast %c7_i32 : i32 to vector<1x128xi32>
    %53 = arith.cmpi ne, %47, %52 : vector<1x128xi32>
    %54 = arith.extui %53 : vector<1x128xi1> to vector<1x128xi32>
    %55 = arith.sitofp %54 : vector<1x128xi32> to vector<1x128xf32>
    %c0_19 = arith.constant 0 : index
    %c0_20 = arith.constant 0 : index
    %56 = vector.load %arg6[%c0_19, %c0_20] : memref<4x4xf32, #tpu.memory_space<vmem>>, vector<4x4xf32>
    %c1_i32_21 = arith.constant 1 : i32
    %57 = tpu.dynamic_rotate %30 by %c1_i32_21 dim 1 : vector<1x128xf32>, i32 -> vector<1x128xf32>
    %58 = arith.mulf %57, %51 : vector<1x128xf32>
    %c127_i32 = arith.constant 127 : i32
    %59 = tpu.dynamic_rotate %30 by %c127_i32 dim 1 : vector<1x128xf32>, i32 -> vector<1x128xf32>
    %60 = arith.mulf %59, %55 : vector<1x128xf32>
    %61 = vector.extract_strided_slice %56 {offsets = [0, 0], sizes = [4, 1], strides = [1, 1]} : vector<4x4xf32> to vector<4x1xf32>
    %62 = vector.broadcast %61 : vector<4x1xf32> to vector<4x128xf32>
    %63 = vector.broadcast %58 : vector<1x128xf32> to vector<4x128xf32>
    %64 = arith.mulf %62, %63 : vector<4x128xf32>
    %65 = vector.extract_strided_slice %56 {offsets = [0, 1], sizes = [4, 1], strides = [1, 1]} : vector<4x4xf32> to vector<4x1xf32>
    %66 = vector.broadcast %65 : vector<4x1xf32> to vector<4x128xf32>
    %67 = vector.broadcast %30 : vector<1x128xf32> to vector<4x128xf32>
    %68 = arith.mulf %66, %67 : vector<4x128xf32>
    %69 = arith.addf %64, %68 : vector<4x128xf32>
    %70 = vector.extract_strided_slice %56 {offsets = [0, 2], sizes = [4, 1], strides = [1, 1]} : vector<4x4xf32> to vector<4x1xf32>
    %71 = vector.broadcast %70 : vector<4x1xf32> to vector<4x128xf32>
    %72 = vector.broadcast %60 : vector<1x128xf32> to vector<4x128xf32>
    %73 = arith.mulf %71, %72 : vector<4x128xf32>
    %74 = arith.addf %69, %73 : vector<4x128xf32>
    %75 = vector.extract_strided_slice %56 {offsets = [0, 3], sizes = [4, 1], strides = [1, 1]} : vector<4x4xf32> to vector<4x1xf32>
    %76 = vector.broadcast %75 : vector<4x1xf32> to vector<4x128xf32>
    %77 = arith.addf %74, %76 : vector<4x128xf32>
    %cst_22 = arith.constant 0.000000e+00 : f32
    %78 = vector.broadcast %cst_22 : f32 to vector<4x128xf32>
    %79 = arith.maximumf %77, %78 : vector<4x128xf32>
    %c1_i32_23 = arith.constant 1 : i32
    %80 = tpu.dynamic_rotate %79 by %c1_i32_23 dim 1 : vector<4x128xf32>, i32 -> vector<4x128xf32>
    %81 = vector.broadcast %51 : vector<1x128xf32> to vector<4x128xf32>
    %82 = arith.mulf %80, %81 : vector<4x128xf32>
    %c127_i32_24 = arith.constant 127 : i32
    %83 = tpu.dynamic_rotate %79 by %c127_i32_24 dim 1 : vector<4x128xf32>, i32 -> vector<4x128xf32>
    %84 = vector.broadcast %55 : vector<1x128xf32> to vector<4x128xf32>
    %85 = arith.mulf %83, %84 : vector<4x128xf32>
    %86 = tpu.concatenate %82, %79, %85 in 0 : vector<4x128xf32>, vector<4x128xf32>, vector<4x128xf32> -> vector<12x128xf32>
    %c0_25 = arith.constant 0 : index
    %c0_26 = arith.constant 0 : index
    %87 = vector.load %arg7[%c0_25, %c0_26] : memref<8x13xf32, #tpu.memory_space<vmem>>, vector<8x13xf32>
    %88 = vector.extract_strided_slice %87 {offsets = [0, 0], sizes = [8, 12], strides = [1, 1]} : vector<8x13xf32> to vector<8x12xf32>
    %cst_27 = arith.constant dense<0.000000e+00> : vector<8x128xf32>
    %89 = tpu.matmul %88, %86, %cst_27 {dimension_numbers = #tpu.dot_dimension_numbers<[1], [0], [0], [1], [0, 0, 1, 1], [], []>} : vector<8x12xf32>, vector<12x128xf32>, vector<8x128xf32> -> vector<8x128xf32>
    %90 = vector.extract_strided_slice %87 {offsets = [0, 12], sizes = [8, 1], strides = [1, 1]} : vector<8x13xf32> to vector<8x1xf32>
    %91 = vector.broadcast %90 : vector<8x1xf32> to vector<8x128xf32>
    %92 = arith.addf %89, %91 : vector<8x128xf32>
    %cst_28 = arith.constant 0.000000e+00 : f32
    %93 = vector.broadcast %cst_28 : f32 to vector<8x128xf32>
    %94 = arith.maximumf %92, %93 : vector<8x128xf32>
    %c0_29 = arith.constant 0 : index
    %c0_30 = arith.constant 0 : index
    %95 = vector.load %arg8[%c0_29, %c0_30] : memref<16x9xf32, #tpu.memory_space<vmem>>, vector<16x9xf32>
    %96 = vector.extract_strided_slice %95 {offsets = [0, 0], sizes = [16, 8], strides = [1, 1]} : vector<16x9xf32> to vector<16x8xf32>
    %cst_31 = arith.constant dense<0.000000e+00> : vector<16x128xf32>
    %97 = tpu.matmul %96, %94, %cst_31 {dimension_numbers = #tpu.dot_dimension_numbers<[1], [0], [0], [1], [0, 0, 1, 1], [], []>} : vector<16x8xf32>, vector<8x128xf32>, vector<16x128xf32> -> vector<16x128xf32>
    %98 = vector.extract_strided_slice %95 {offsets = [0, 8], sizes = [16, 1], strides = [1, 1]} : vector<16x9xf32> to vector<16x1xf32>
    %99 = vector.broadcast %98 : vector<16x1xf32> to vector<16x128xf32>
    %100 = arith.addf %97, %99 : vector<16x128xf32>
    %cst_32 = arith.constant 0.000000e+00 : f32
    %101 = vector.broadcast %cst_32 : f32 to vector<16x128xf32>
    %102 = arith.maximumf %100, %101 : vector<16x128xf32>
    %c0_33 = arith.constant 0 : index
    %c0_34 = arith.constant 0 : index
    %103 = vector.load %arg9[%c0_33, %c0_34] : memref<4x17xf32, #tpu.memory_space<vmem>>, vector<4x17xf32>
    %104 = vector.extract_strided_slice %103 {offsets = [0, 0], sizes = [4, 16], strides = [1, 1]} : vector<4x17xf32> to vector<4x16xf32>
    %cst_35 = arith.constant dense<0.000000e+00> : vector<4x128xf32>
    %105 = tpu.matmul %104, %102, %cst_35 {dimension_numbers = #tpu.dot_dimension_numbers<[1], [0], [0], [1], [0, 0, 1, 1], [], []>} : vector<4x16xf32>, vector<16x128xf32>, vector<4x128xf32> -> vector<4x128xf32>
    %106 = vector.extract_strided_slice %103 {offsets = [0, 16], sizes = [4, 1], strides = [1, 1]} : vector<4x17xf32> to vector<4x1xf32>
    %107 = vector.broadcast %106 : vector<4x1xf32> to vector<4x128xf32>
    %108 = arith.addf %105, %107 : vector<4x128xf32>
    %c0_36 = arith.constant 0 : index
    %c0_37 = arith.constant 0 : index
    %109 = vector.load %arg10[%c0_36, %c0_37] : memref<4x128xf32, #tpu.memory_space<vmem>>, vector<4x128xf32>
    tpu.vector_store %arg10[%c0_36, %c0_37], %108 {strides = array<i32>} : memref<4x128xf32, #tpu.memory_space<vmem>>, vector<4x128xf32>,
    return
  }
  func.func @transform_0(%arg0: i32) -> (i32, i32) {
    %c0_i32 = arith.constant 0 : i32
    %c0_i32_0 = arith.constant 0 : i32
    return %c0_i32, %arg0 : i32, i32
  }
  func.func @transform_1(%arg0: i32) -> (i32, i32) {
    %c0_i32 = arith.constant 0 : i32
    %c0_i32_0 = arith.constant 0 : i32
    %c0_i32_1 = arith.constant 0 : i32
    return %c0_i32, %c0_i32_0 : i32, i32
  }
  func.func @transform_2(%arg0: i32) -> (i32, i32) {
    %c0_i32 = arith.constant 0 : i32
    %c0_i32_0 = arith.constant 0 : i32
    %c0_i32_1 = arith.constant 0 : i32
    return %c0_i32, %c0_i32_0 : i32, i32
  }
  func.func @transform_3(%arg0: i32) -> (i32, i32) {
    %c0_i32 = arith.constant 0 : i32
    %c0_i32_0 = arith.constant 0 : i32
    %c0_i32_1 = arith.constant 0 : i32
    return %c0_i32, %c0_i32_0 : i32, i32
  }
  func.func @transform_4(%arg0: i32) -> (i32, i32) {
    %c0_i32 = arith.constant 0 : i32
    %c0_i32_0 = arith.constant 0 : i32
    %c0_i32_1 = arith.constant 0 : i32
    return %c0_i32, %c0_i32_0 : i32, i32
  }
  func.func @transform_5(%arg0: i32) -> (i32, i32) {
    %c0_i32 = arith.constant 0 : i32
    %c0_i32_0 = arith.constant 0 : i32
    %c0_i32_1 = arith.constant 0 : i32
    return %c0_i32, %c0_i32_0 : i32, i32
  }
  func.func @transform_6(%arg0: i32) -> (i32, i32) {
    %c0_i32 = arith.constant 0 : i32
    %c0_i32_0 = arith.constant 0 : i32
    %c0_i32_1 = arith.constant 0 : i32
    return %c0_i32, %c0_i32_0 : i32, i32
  }
  func.func @transform_7(%arg0: i32) -> (i32, i32) {
    %c0_i32 = arith.constant 0 : i32
    %c0_i32_0 = arith.constant 0 : i32
    %c0_i32_1 = arith.constant 0 : i32
    return %c0_i32, %c0_i32_0 : i32, i32
  }
  func.func @transform_8(%arg0: i32) -> (i32, i32) {
    %c0_i32 = arith.constant 0 : i32
    %c0_i32_0 = arith.constant 0 : i32
    %c0_i32_1 = arith.constant 0 : i32
    return %c0_i32, %c0_i32_0 : i32, i32
  }
  func.func @transform_9(%arg0: i32) -> (i32, i32) {
    %c0_i32 = arith.constant 0 : i32
    %c0_i32_0 = arith.constant 0 : i32
    return %c0_i32, %arg0 : i32, i32
  }
}

</mosaic_0001>

<bundles_post_ra>
// kernel: tpu_custom_call.1
= control target key start
LH: loop header
LB: loop body
LE: loop exit
PB: predicated region body
PF: predicated region fallthrough
CT: control target
= control target key end

     0   :  { %14 = vsyncpa [#allocation3], 0  ;;  %s2417_s0 = inlined_call_operand.hbm [shape: f32[32,256], index: 0, kind: input, shape index: {}]   ;;  %s2418_s1 = inlined_call_operand.vmem [shape: f32[128,33], index: 1, kind: input, shape index: {}]   ;;  %s2419_s2 = inlined_call_operand.vmem [shape: f32[64,129], index: 2, kind: input, shape index: {}]   ;;  %s2420_s3 = inlined_call_operand.vmem [shape: f32[32,65], index: 3, kind: input, shape index: {}]   ;;  %s2421_s4 = inlined_call_operand.vmem [shape: f32[1,33], index: 4, kind: input, shape index: {}]   ;;  %s2422_s5 = inlined_call_operand.hbm [shape: f32[4,4], index: 5, kind: input, shape index: {}]   ;;  %s2423_s6 = inlined_call_operand.vmem [shape: f32[8,13], index: 6, kind: input, shape index: {}]   ;;  %s2424_s7 = inlined_call_operand.vmem [shape: f32[16,9], index: 7, kind: input, shape index: {}]   ;;  %s2425_s8 = inlined_call_operand.vmem [shape: f32[4,17], index: 8, kind: input, shape index: {}]   ;;  %s2426_s9 = inlined_call_operand.hbm [shape: f32[4,256], index: 9, kind: output, shape index: {}]  }
   0x1   :  { %16 = vsyncpa [#allocation3 + $0x1], 0 }
   0x2   :  { %17 = vsyncpa [#allocation6], 0 }
   0x3   :  { %18 = vsyncpa [#allocation4], 0 }
   0x4   :  { %20 = vsyncpa [#allocation4 + $0x1], 0  ;;  %s2054_s30 = smov 0   ;;  %s2056_s10 = smov 0  }
   0x5   :  { %s2058_s11 = smov 0   ;;  %s2060_s12 = smov 0  }
   0x6 LB: > { %2436 = sst [smem:[#allocation11_spill]] %s1977_s11  ;;  %s2075_s13 = sadd.s32 4294967295, %s1981_s12   ;;  %s1981_s12 = sphi %s2060_s12, %s2457_s12   ;;  %s1977_s11 = sphi %s2058_s11, %s2459_s11   ;;  %s1973_s10 = sphi %s2056_s10, %s2461_s10   ;;  %s1969_s30 = sphi %s2054_s30, %s2460_s30  }
   0x7   : > { %s1455_s14 = sadd.s32 4294967294, %s1981_s12   ;;  %s2079_s15 = sadd.s32 1, %s1981_s12  }
   0x8   : > { %2437 = sst [smem:[#allocation12_spill]] %s2079_s15  ;;  %s33_s16 = sadd.s32 1, %s1977_s11 }
   0x9   : > { %s30_s17 = ssub.s32 %s1981_s12, %s2079_s15  ;;  %p40_p0 = scmp.ne.s32.totalorder %s1977_s11, %s1973_s10 }
   0xa   : > { %p31_p1 = scmp.eq.s32.totalorder %s30_s17, 0  ;;  %p41_p2 = scmp.eq.s32.totalorder %s1981_s12, 0 }
   0xb   : > { %p46_p3 = scmp.ne.s32.totalorder %s1973_s10, %s1969_s30  ;;  %p2427_p4 = scmp.eq.s32.totalorder %s2075_s13, 0 }
   0xc   : > { %s2091_s18 = scalar_select %p31_p1, %s1977_s11, %s33_s16  }
   0xd   : > { %p2093_p5 = por %p41_p2, %p40_p0  ;;  %p2099_p6 = por %p2427_p4, %p46_p3 }
   0xe   : > { %2438 = sst [smem:[#allocation13_spill]] %s2091_s18  ;;  %p238_p7 = scmp.eq.s32.totalorder %s2075_s13, 1 }
   0xf   : > { %s2440_s20 = scalar_select %p2099_p6, 1, 0 }
  0x10   : > { %p244_p8 = scmp.eq.s32.totalorder %s1455_s14, 1  ;;  %p1456_p9 = scmp.ge.s32.totalorder %s1981_s12, 1 }
  0x11   : > { %p251_p10 = scmp.lt.s32.totalorder %s1981_s12, 3  ;;  %p2106_p11 = por %p238_p7, %p40_p0 }
  0x12   : > { %p2110_p12 = por %p244_p8, %p46_p3  ;;  %s1983_s24 = smov [#allocation5]  }
  0x13   : > { %s2441_s21 = scalar_select %p2106_p11, 1, 0 }
  0x14   : > { %s2442_s22 = scalar_select %p2110_p12, 1, 0 }
  0x15   : > { %p2114_p13 = pnand %p1456_p9, %p251_p10  ;;  %s276_s25 = sshll.u32 %s1983_s24, 4  ;;  %s277_s25 = int_to_ptr.vmem [resolvable:$true] %s276_s25 }
  0x16   : > { %2443 = sst [smem:[#allocation14_spill]] %s2442_s22  ;;  %p1785_p4 = scmp.lt.s32.totalorder %s1981_s12, 2 }
  0x17   : > { %s2444_s23 = scalar_select %p2114_p13, 1, 0 }
  0x18   : > { %p1772_p2 = pneg %p2114_p13  ;;  %p2445_p0 = scmp.eq.s32.totalorder %s2075_s13, 0 }
  0x19   : > { %s296_s27 = sand.u32 1, %s1977_s11   ;;  %p2131_p3 = pnand %p1785_p4, %p2093_p5 }
  0x1a   : > { %p2124_p7 = pnand %p1772_p2, %p2445_p0  ;;  %s1459_s29 = sshll.u32 %s296_s27, 5 }
  0x1b   : > { %s2447_s28 = scalar_select %p2131_p3, 1, 0 }
  0x1c   : > { %s1853_s17 = scalar_lea.hbm %s2422_s5, 64  ;;  %p1855_p9 = pneg %p2124_p7 }
  0x1d   : > { %p1854_p8 = scmp.ne.s32.totalorder %s2422_s5, %s1853_s17  ;;  %p1860_p4 = scmp.lt.u32.totalorder %s1853_s17, %s2422_s5 }
  0x1f   : > { %p1856_p10 = pnand %p1855_p9, %p1854_p8 }
  0x21   : > { %p1857_p2 = pneg %p1856_p10 }
  0x23   : > { %p1862_p5 = pnand %p1860_p4, %p1857_p2 }
  0x25   : > { %1865 = shalt.err (!%p1862_p5)
}
  0x26   : > { %s1866_s19 = scalar_lea.vmem %s277_s25, 64  ;;  %p1874_p11 = scmp.lt.s32.totalorder %s277_s25, %s277_s25 }
  0x27   : > { %p1867_p0 = scmp.ne.s32.totalorder %s277_s25, %s1866_s19  ;;  %p1875_p6 = scmp.lt.s32.totalorder %s1866_s19, %s1866_s19 }
  0x29   : > { %p1869_p1 = pnand %p1867_p0, %p1855_p9  ;;  %p1876_p13 = por %p1875_p6, %p1874_p11 }
  0x2b   : > { %p1870_p12 = pneg %p1869_p1 }
  0x2d   : > { %p1877_p3 = pnand %p1876_p13, %p1870_p12 }
  0x2f   : > { %1880 = shalt.err (!%p1877_p3)
}
  0x30   : > { %1775 = dma.hbm_to_vmem [thread:$0]  (!%p2124_p7), %s2422_s5, 64, %s277_s25, [#allocation6]  }
  0x31   : > { %s1460_s11 = sshll.u32 %s1981_s12, 7  ;;  %s300_s15 = scalar_lea.vmem [#allocation2], %s1459_s29 }
  0x32   : > { %s306_s16 = sshll.u32 %s300_s15, 4  ;;  %s2155_s22 = scalar_lea.hbm %s2417_s0, %s1460_s11  ;;  %s2157_s16 = int_to_ptr.vmem [resolvable:$true] %s306_s16 }
  0x33   : > { %s2159_s26 = scalar_lea.sflag [#allocation3], %s296_s27  ;;  %s1881_s19 = scalar_lea.hbm %s2155_s22, 512 }
  0x34   : > { %p1882_p6 = scmp.ne.s32.totalorder %s2155_s22, %s1881_s19  ;;  %p2448_p11 = scmp.ne.s32.totalorder %s2447_s28, 0 }
  0x35   : > { %s1886_s18 = scalar_lea.hbm %s2417_s0, 1024  ;;  %p1887_p7 = scmp.lt.u32.totalorder %s2155_s22, %s2417_s0 }
  0x36   : > { %p1883_p12 = pneg %p2448_p11  ;;  %p1888_p3 = scmp.lt.u32.totalorder %s1886_s18, %s1881_s19 }
  0x37   : > { %p1890_p9 = scmp.lt.u32.totalorder %s1881_s19, %s2155_s22 }
  0x38   : > { %p1884_p13 = pnand %p1883_p12, %p1882_p6  ;;  %p1889_p8 = por %p1888_p3, %p1887_p7 }
  0x3a   : > { %p1885_p1 = pneg %p1884_p13  ;;  %p1891_p10 = por %p1890_p9, %p1889_p8 }
  0x3c   : > { %p1892_p2 = pnand %p1891_p10, %p1885_p1 }
  0x3e   : > { %1895 = shalt.err (!%p1892_p2)
}
  0x3f   : > { %s1896_s27 = scalar_lea.vmem %s2157_s16, 512  ;;  %s1984_s15 = smov [#allocation2]  }
  0x40   : > { %p1897_p4 = scmp.ne.s32.totalorder %s2157_s16, %s1896_s27  ;;  %s1901_s17 = sshll.u32 %s1984_s15, 4  ;;  %s1902_s17 = int_to_ptr.vmem [resolvable:$false] %s1901_s17 }
  0x41   : > { %s1903_s24 = scalar_lea.vmem %s1902_s17, 1024  ;;  %p1904_p6 = scmp.lt.s32.totalorder %s2157_s16, %s1902_s17 }
  0x42   : > { %p1899_p5 = pnand %p1897_p4, %p1883_p12  ;;  %p1905_p13 = scmp.lt.s32.totalorder %s1903_s24, %s1896_s27 }
  0x44   : > { %p1900_p0 = pneg %p1899_p5  ;;  %p1906_p7 = por %p1905_p13, %p1904_p6 }
  0x46   : > { %p1907_p3 = pnand %p1906_p7, %p1900_p0 }
  0x48   : > { %1910 = shalt.err (!%p1907_p3)
}
  0x49   : > { %s1985_s19 = smov 256   ;;  %s1986_s25 = smov 128  }
  0x4a   : > { %s1987_s29 = smov 8   ;;  %p2449_p12 = scmp.ne.s32.totalorder %s2444_s23, 0 }
  0x4b   : > { %1779 = dma.hbm_to_vmem [thread:$0]  (!%p2448_p11), %s2155_s22, 512, %s2157_s16, %s2159_s26, %s1985_s19, %s1986_s25, %s1987_s29  }
  0x4c   : > { %318 = sbr.rel (%p2449_p12) target bundleno = 1949 (0x79d), region = 56  ;;  %s2190_s18 = sand.u32 (!%p2449_p12), 1, %s1973_s10  }
  0x4d   : > { %s1462_s14 = sshll.u32 (!%p2449_p12), %s2190_s18, 5  ;;  %s321_s11 = scalar_lea.sflag (!%p2449_p12), [#allocation3], %s2190_s18 }
  0x4e   : > { %s324_s27 = scalar_lea.vmem (!%p2449_p12), [#allocation2], %s1462_s14  ;;  %p2450_p1 = scmp.ne.s32.totalorder (!%p2449_p12), %s2440_s20, 0 }
  0x53   : > { %1956 = dma.done.wait (%p2450_p1), %s321_s11, 512  }
  0x54   : > { %1958 = vsyncadd (%p2450_p1), %s321_s11, 4294966784  ;;  %p2451_p8 = scmp.eq.s32.totalorder %s2075_s13, 0 }
  0x56   : > { %1960 = dma.done.wait (%p2451_p8), [#allocation6], 64   ;;  %p2452_p11 = pmov %p2451_p8 }
  0x57   : > { %v1988_v0 = vmov 32   ;;  %vm463_vm0 = vcmask 261120   ;;  %v363_v1 = vld [vmem:[%s324_s27] sm:$0xff]  ;;  %v364_v2 = vld [vmem:[%s324_s27 + $0x8] sm:$0xff]  ;;  %v365_v3 = vld [vmem:[%s324_s27 + $0x10] sm:$0xff]  ;;  %v1989_v26 = vmov 0  }
  0x58   : > { %1962 = vsyncadd (%p2452_p11), [#allocation6], 4294967232  ;;  %1839 = vset.pattern.permute.xlu0 %v1988_v0  ;;  %1840 = vset.pattern.permute.xlu1 %v1988_v0  ;;  %v1695_v4 = vpack.c.bf16 %v364_v2, %v363_v1  ;;  %v366_v5 = vld [vmem:[%s324_s27 + $0x18] sm:$0xff]  ;;  %v367_v6 = vld [vmem:[%s2418_s1] sm:$0xff]  ;;  %vm850_vm1 = vcmask 523264   ;;  %vm1992_vm2 = vmmov 0  }
  0x59   : > { %v1699_v7 = vpack.c.bf16 %v366_v5, %v365_v3  ;;  %1575 = vmatprep.mubr.msk.f32.mxu0 %vm463_vm0, %v367_v6  ;;  %v369_v8 = vld [vmem:[%s2418_s1 + $0x10] sm:$0xff]  ;;  %385 = vperm.xlu0 %1839, %v367_v6   ;;  %v368_v9 = vld [vmem:[%s2418_s1 + $0x8] sm:$0xff]  ;;  %v370_v10 = vld [vmem:[%s2418_s1 + $0x18] sm:$0xff]  ;;  %s1997_s27 = smov 1   ;;  %s1998_s22 = smov 127   ;;  %vm1102_vm5 = vcmask 1043456  }
  0x5a   : > { %1696 = vmatprep.subr.bf16.mxu0 %v1695_v4  ;;  %395 = vperm.xlu1 %1840, %v369_v8   ;;  %v371_v11 = vld [vmem:[%s2418_s1 + $0x20] sm:$0xff]  ;;  %v372_v12 = vld [vmem:[%s2418_s1 + $0x28] sm:$0xff]  ;;  %v373_v13 = vld [vmem:[%s2418_s1 + $0x30] sm:$0xff]  ;;  %vm2000_vm6 = vmmov 1   ;;  %vm1110_vm8 = vcmask 97280   ;;  %vm1199_vm9 = vcmask 64512  }
  0x5b   : > { %1698 = vmatpush3.bf16.msra.mxu0 %v1695_v4  ;;  %v374_v14 = vld [vmem:[%s2418_s1 + $0x38] sm:$0xff]  ;;  %v375_v15 = vld [vmem:[%s2418_s1 + $0x40] sm:$0xff]  ;;  %v376_v16 = vld [vmem:[%s2418_s1 + $0x48] sm:$0xff]  ;;  %vm1287_vm10 = vcmask 130048   ;;  %s1464_s19 = sshll.u32 %s2190_s18, 2  ;;  %s1494_s25 = sshll.u32 %s2075_s13, 6 }
  0x5c   : > { %1700 = vmatprep.subr.bf16.mxu0 %v1699_v7  ;;  %v377_v17 = vld [vmem:[%s2418_s1 + $0x50] sm:$0xff]  ;;  %v378_v18 = vld [vmem:[%s2418_s1 + $0x58] sm:$0xff]  ;;  %v379_v19 = vld [vmem:[%s2418_s1 + $0x60] sm:$0xff]  ;;  %s362_s29 = scalar_lea.vmem [#allocation7], %s1464_s19  ;;  %s1362_s20 = scalar_lea.sflag [#allocation4], %s2190_s18 }
  0x5d   : > { %390 = vperm.xlu0 %1839, %v368_v9   ;;  %v380_v20 = vld [vmem:[%s2418_s1 + $0x68] sm:$0xff]  ;;  %v381_v21 = vld [vmem:[%s2418_s1 + $0x70] sm:$0xff]  ;;  %v382_v22 = vld [vmem:[%s2418_s1 + $0x78] sm:$0xff]  ;;  %s1375_s14 = sshll.u32 %s362_s29, 4  ;;  %p2453_p10 = scmp.ne.s32.totalorder %s2441_s21, 0  ;;  %s2375_s14 = int_to_ptr.vmem [resolvable:$true] %s1375_s14 }
  0x5e   : > { %400 = vperm.xlu1 %1840, %v370_v10   ;;  %v657_v23 = vld [vmem:[%s2419_s2] sm:$0xff]  ;;  %v660_v24 = vld [vmem:[%s2419_s2 + $0x18] sm:$0xff]  ;;  %v658_v25 = vld [vmem:[%s2419_s2 + $0x8] sm:$0xff]  ;;  %s1911_s23 = scalar_lea.vmem %s2375_s14, 64  ;;  %s2003_s13 = smov [#allocation7]  }
  0x5f   : > { %1702 = vmatpush3.bf16.msra.mxu0 %v1699_v7  ;;  %1631 = vmatprep.mubr.f32.mxu1 %v657_v23  ;;  %v662_v27 = vld [vmem:[%s2419_s2 + $0x28] sm:$0xff]  ;;  %v664_v28 = vld [vmem:[%s2419_s2 + $0x38] sm:$0xff]  ;;  %vm1759_vm7 = vmpackc.low %vm1102_vm5, %vm2000_vm6  ;;  %p1912_p9 = scmp.ne.s32.totalorder %s2375_s14, %s1911_s23  ;;  %s1915_s28 = sshll.u32 %s2003_s13, 4  ;;  %s1916_s28 = int_to_ptr.vmem [resolvable:$false] %s1915_s28 }
  0x60   : > { %v666_v29 = vld [vmem:[%s2419_s2 + $0x48] sm:$0xff]  ;;  %v668_v30 = vld [vmem:[%s2419_s2 + $0x58] sm:$0xff]  ;;  %s1917_s16 = scalar_lea.vmem %s1916_s28, 128  ;;  %p1918_p5 = scmp.lt.s32.totalorder %s2375_s14, %s1916_s28 }
  0x61   : > { %405 = vperm.xlu0 %1839, %v371_v11   ;;  %v670_v31 = vld [vmem:[%s2419_s2 + $0x68] sm:$0xff]  ;;  %v672_v32 = vld [vmem:[%s2419_s2 + $0x78] sm:$0xff]  ;;  %p1913_p2 = pnand %p1912_p9, %p2453_p10  ;;  %p1919_p0 = scmp.lt.s32.totalorder %s1917_s16, %s1911_s23 }
  0x62   : > { %1576 = vmatmul.mubr.msk.f32.vlgmr.msra.gmra.mrb[0].mxu0 %vm463_vm0, %v368_v9  ;;  %410 = vperm.xlu1 %1840, %v372_v12  }
  0x63   : > { %1578 = vmatprep.mubr.msk.f32.mxu0 %vm463_vm0, %v369_v8  ;;  %p1914_p4 = pneg %p1913_p2  ;;  %p1920_p6 = por %p1919_p0, %p1918_p5 }
  0x65   : > { %415 = vperm.xlu0 %1839, %v373_v13   ;;  %p1921_p13 = pnand %p1920_p6, %p1914_p4 }
  0x66   : > { %1579 = vmatmul.mubr.msk.f32.gmra.mrb[2].mxu0 %vm463_vm0, %v370_v10  ;;  %420 = vperm.xlu1 %1840, %v374_v14  }
  0x67   : > { %1581 = vmatprep.mubr.msk.f32.mxu0 %vm463_vm0, %v371_v11 }
  0x69   : > { %425 = vperm.xlu0 %1839, %v375_v15  }
  0x6a   : > { %1582 = vmatmul.mubr.msk.f32.gmra.mrb[4].mxu0 %vm463_vm0, %v372_v12  ;;  %430 = vperm.xlu1 %1840, %v376_v16  }
  0x6b   : > { %1584 = vmatprep.mubr.msk.f32.mxu0 %vm463_vm0, %v373_v13 }
  0x6d   : > { %435 = vperm.xlu0 %1839, %v377_v17  }
  0x6e   : > { %1585 = vmatmul.mubr.msk.f32.gmra.mrb[6].mxu0 %vm463_vm0, %v374_v14  ;;  %440 = vperm.xlu1 %1840, %v378_v18  }
  0x6f   : > { %1587 = vmatprep.mubr.msk.f32.mxu0 %vm463_vm0, %v375_v15 }
  0x71   : > { %445 = vperm.xlu0 %1839, %v379_v19  }
  0x72   : > { %1588 = vmatmul.mubr.msk.f32.gmra.mrb[8].mxu0 %vm463_vm0, %v376_v16  ;;  %450 = vperm.xlu1 %1840, %v380_v20  }
  0x73   : > { %1590 = vmatprep.mubr.msk.f32.mxu0 %vm463_vm0, %v377_v17 }
  0x75   : > { %455 = vperm.xlu0 %1839, %v381_v21  }
  0x76   : > { %1591 = vmatmul.mubr.msk.f32.gmra.mrb[10].mxu0 %vm463_vm0, %v378_v18  ;;  %460 = vperm.xlu1 %1840, %v382_v22  }
  0x77   : > { %1593 = vmatprep.mubr.msk.f32.mxu0 %vm463_vm0, %v379_v19 }
  0x79   : > { %1841 = vset.pattern.permute.xlu0 %v1989_v26 }
  0x7a   : > { %1594 = vmatmul.mubr.msk.f32.gmra.mrb[12].mxu0 %vm463_vm0, %v380_v20  ;;  %1842 = vset.pattern.permute.xlu1 %v1989_v26 }
  0x7b   : > { %1596 = vmatprep.mubr.msk.f32.mxu0 %vm463_vm0, %v381_v21  ;;  %680 = vperm.xlu1 %1842, %v660_v24  }
  0x7c   : > { %675 = vperm.xlu0 %1841, %v658_v25  }
  0x7e   : > { %1597 = vmatmul.mubr.msk.f32.gmra.mrb[14].mxu0 %vm463_vm0, %v382_v22 }
  0x7f   : > { %685 = vperm.xlu1 %1842, %v662_v27  }
  0x80   : > { %690 = vperm.xlu0 %1841, %v664_v28  }
  0x83   : > { %695 = vperm.xlu1 %1842, %v666_v29  }
  0x84   : > { %700 = vperm.xlu0 %1841, %v668_v30  }
  0x87   : > { %705 = vperm.xlu1 %1842, %v670_v31  }
  0x88   : > { %710 = vperm.xlu0 %1841, %v672_v32  }
  0xd8   : > { %v386_v34 = vpop.permute.xlu0 %385 }
  0xd9   : > { %v396_v33 = vpop.permute.xlu1 %395 }
  0xdc   : > { %v391_v36 = vpop.permute.xlu0 %390 }
  0xdd   : > { %v401_v35 = vpop.permute.xlu1 %400 }
  0xe0   : > { %v406_v38 = vpop.permute.xlu0 %405 }
  0xe1   : > { %v411_v37 = vpop.permute.xlu1 %410 }
  0xe4   : > { %v416_v47 = vpop.permute.xlu0 %415 }
  0xe5   : > { %v421_v44 = vpop.permute.xlu1 %420 }
  0xe8   : > { %v426_v60 = vpop.permute.xlu0 %425 }
  0xe9   : > { %v431_v57 = vpop.permute.xlu1 %430 }
  0xec   : > { %v436_v9 = vpop.permute.xlu0 %435 }
  0xed   : > { %v441_v6 = vpop.permute.xlu1 %440 }
  0xf0   : > { %v446_v22 = vpop.permute.xlu0 %445 }
  0xf1   : > { %v451_v19 = vpop.permute.xlu1 %450 }
  0xf5   : > { %v461_v32 = vpop.permute.xlu1 %460 }
 0x135   : > { %v1577_v39 = vpop.f32.mrb[0].mxu0 }
 0x136   : > { %v568_v40 = vadd.f32 %v1577_v39, %v391_v36  ;;  %v562_v41 = vpop.f32.mrb[1].mxu0 }
 0x137   : > { %v563_v42 = vadd.f32 %v562_v41, %v386_v34 }
 0x138   : > { %v642_v43 = vmax.f32 %v568_v40, 0.0 }
 0x139   : > { %v641_v45 = vmax.f32 %v563_v42, 0.0  ;;  %v1580_v46 = vpop.f32.mrb[2].mxu0 }
 0x13a   : > { %v578_v48 = vadd.f32 %v1580_v46, %v401_v35  ;;  %v572_v49 = vpop.f32.mrb[3].mxu0  ;;  %v456_v35 = vpop.permute.xlu0 %455  ;;  %v665_v46 = vld [vmem:[%s2419_s2 + $0x40] sm:$0xff] }
 0x13b   : > { %v573_v50 = vadd.f32 %v572_v49, %v396_v33  ;;  %v1703_v51 = vpack.c.bf16 %v642_v43, %v641_v45  ;;  %v659_v43 = vld [vmem:[%s2419_s2 + $0x10] sm:$0xff] }
 0x13c   : > { %v644_v52 = vmax.f32 %v578_v48, 0.0  ;;  %v663_v45 = vld [vmem:[%s2419_s2 + $0x30] sm:$0xff]  ;;  %v669_v48 = vld [vmem:[%s2419_s2 + $0x60] sm:$0xff] }
 0x13d   : > { %v643_v53 = vmax.f32 %v573_v50, 0.0  ;;  %v1583_v54 = vpop.f32.mrb[4].mxu0  ;;  %1704 = vmatprep.subr.bf16.mxu1 %v1703_v51  ;;  %v671_v49 = vld [vmem:[%s2419_s2 + $0x70] sm:$0xff]  ;;  %v826_v50 = vld [vmem:[%s2420_s3] sm:$0xff] }
 0x13e   : > { %v588_v55 = vadd.f32 %v1583_v54, %v411_v37  ;;  %v582_v56 = vpop.f32.mrb[5].mxu0  ;;  %1706 = vmatpush3.bf16.msra.mxu1 %v1703_v51  ;;  %1659 = vmatprep.mubr.msk.f32.mxu0 %vm850_vm1, %v826_v50  ;;  %v827_v51 = vld [vmem:[%s2420_s3 + $0x8] sm:$0xff]  ;;  %v829_v54 = vld [vmem:[%s2420_s3 + $0x18] sm:$0xff] }
 0x13f   : > { %v1707_v58 = vpack.c.bf16 %v644_v52, %v643_v53  ;;  %v583_v59 = vadd.f32 %v582_v56, %v406_v38  ;;  %v1990_v52 = vmov 64   ;;  %v828_v53 = vld [vmem:[%s2420_s3 + $0x10] sm:$0xff]  ;;  %v681_v56 = vpop.permute.xlu1 %680 }
 0x140   : > { %v646_v61 = vmax.f32 %v588_v55, 0.0  ;;  %1843 = vset.pattern.permute.xlu1 %v1990_v52  ;;  %1844 = vset.pattern.permute.xlu0 %v1990_v52  ;;  %v676_v55 = vpop.permute.xlu0 %675  ;;  %v954_v52 = vlaneseq }
 0x141   : > { %v645_v62 = vmax.f32 %v583_v59, 0.0  ;;  %v1586_v63 = vpop.f32.mrb[6].mxu0  ;;  %1708 = vmatprep.subr.bf16.mxu1 %v1707_v58  ;;  %832 = vperm.xlu1 %1843, %v826_v50  }
 0x142   : > { %v598_v1 = vadd.f32 %v1586_v63, %v421_v44  ;;  %v592_v2 = vpop.f32.mrb[7].mxu0  ;;  %1710 = vmatpush3.bf16.msra.mxu1 %v1707_v58  ;;  %v661_v44 = vld [vmem:[%s2419_s2 + $0x20] sm:$0xff]  ;;  %837 = vperm.xlu0 %1844, %v827_v51  }
 0x143   : > { %v1711_v3 = vpack.c.bf16 %v646_v61, %v645_v62  ;;  %v593_v4 = vadd.f32 %v592_v2, %v416_v47  ;;  %v667_v47 = vld [vmem:[%s2419_s2 + $0x50] sm:$0xff]  ;;  %v686_v59 = vpop.permute.xlu1 %685 }
 0x144   : > { %v648_v5 = vmax.f32 %v598_v1, 0.0 }
 0x145   : > { %v647_v7 = vmax.f32 %v593_v4, 0.0  ;;  %v1589_v8 = vpop.f32.mrb[8].mxu0  ;;  %1712 = vmatprep.subr.bf16.mxu1 %v1711_v3  ;;  %842 = vperm.xlu1 %1843, %v828_v53  }
 0x146   : > { %v608_v10 = vadd.f32 %v1589_v8, %v431_v57  ;;  %v602_v11 = vpop.f32.mrb[9].mxu0  ;;  %1714 = vmatpush3.bf16.msra.mxu1 %v1711_v3  ;;  %1845 = vset.pattern.permute.xlu0 %v1988_v0  ;;  %v691_v57 = vpop.permute.xlu0 %690 }
 0x147   : > { %v1715_v12 = vpack.c.bf16 %v648_v5, %v647_v7  ;;  %v603_v13 = vadd.f32 %v602_v11, %v426_v60  ;;  %v696_v7 = vpop.permute.xlu1 %695 }
 0x148   : > { %v650_v14 = vmax.f32 %v608_v10, 0.0 }
 0x149   : > { %v649_v15 = vmax.f32 %v603_v13, 0.0  ;;  %v1592_v16 = vpop.f32.mrb[10].mxu0  ;;  %1716 = vmatprep.subr.bf16.mxu1 %v1715_v12  ;;  %847 = vperm.xlu1 %1843, %v829_v54  }
 0x14a   : > { %v618_v17 = vadd.f32 %v1592_v16, %v441_v6  ;;  %v612_v18 = vpop.f32.mrb[11].mxu0  ;;  %1718 = vmatpush3.bf16.msra.mxu1 %v1715_v12  ;;  %v701_v4 = vpop.permute.xlu0 %700 }
 0x14b   : > { %v1719_v20 = vpack.c.bf16 %v650_v14, %v649_v15  ;;  %v613_v21 = vadd.f32 %v612_v18, %v436_v9  ;;  %v706_v18 = vpop.permute.xlu1 %705 }
 0x14c   : > { %v652_v23 = vmax.f32 %v618_v17, 0.0 }
 0x14d   : > { %v651_v24 = vmax.f32 %v613_v21, 0.0  ;;  %v1595_v25 = vpop.f32.mrb[12].mxu0  ;;  %1720 = vmatprep.subr.bf16.mxu1 %v1719_v20  ;;  %1846 = vset.pattern.permute.xlu1 %v1989_v26 }
 0x14e   : > { %v628_v27 = vadd.f32 %v1595_v25, %v451_v19  ;;  %v622_v28 = vpop.f32.mrb[13].mxu0  ;;  %1722 = vmatpush3.bf16.msra.mxu1 %v1719_v20  ;;  %v711_v15 = vpop.permute.xlu0 %710 }
 0x14f   : > { %v1723_v29 = vpack.c.bf16 %v652_v23, %v651_v24  ;;  %v623_v30 = vadd.f32 %v622_v28, %v446_v22  ;;  %v948_v28 = vld [vmem:[%s2421_s4] sm:$0x1] }
 0x150   : > { %v654_v31 = vmax.f32 %v628_v27, 0.0  ;;  %v1991_v27 = vmov 0.0|0.0   ;;  %951 = vperm.xlu0 %1845, %v948_v28  }
 0x151   : > { %v653_v33 = vmax.f32 %v623_v30, 0.0  ;;  %v1598_v34 = vpop.f32.mrb[14].mxu0  ;;  %1724 = vmatprep.subr.bf16.mxu1 %v1723_v29  ;;  %v1050_v30 = vld [vmem:[#allocation5] sm:$0xf] }
 0x152   : > { %v638_v36 = vadd.f32 %v1598_v34, %v461_v32  ;;  %v632_v37 = vpop.f32.mrb[15].mxu0  ;;  %1726 = vmatpush3.bf16.msra.mxu1 %v1723_v29  ;;  %v1993_v29 = vmov 0.0   ;;  %1059 = vperm.xlu1 %1846, %v1050_v30   ;;  %v1995_v32 = vmov 1  }
 0x153   : > { %v1727_v38 = vpack.c.bf16 %v654_v31, %v653_v33  ;;  %v633_v39 = vadd.f32 %v632_v37, %v456_v35  ;;  %v1994_v31 = vmov 2  }
 0x154   : > { %v656_v40 = vmax.f32 %v638_v36, 0.0  ;;  %1848 = vset.pattern.permute.xlu0 %v1994_v31  ;;  %v1188_v31 = vld [vmem:[%s2424_s7 + $0x8] sm:$0xff] }
 0x155   : > { %v655_v41 = vmax.f32 %v633_v39, 0.0  ;;  %1728 = vmatprep.subr.bf16.mxu1 %v1727_v38  ;;  %1078 = vperm.xlu0 %1848, %v1050_v30  }
 0x156   : > { %1730 = vmatpush3.bf16.msra.mxu1 %v1727_v38  ;;  %1847 = vset.pattern.permute.xlu1 %v1995_v32 }
 0x157   : > { %v1731_v42 = vpack.c.bf16 %v656_v40, %v655_v41  ;;  %1068 = vperm.xlu1 %1847, %v1050_v30  }
 0x159   : > { %1732 = vmatprep.subr.bf16.mxu1 %v1731_v42 }
 0x15a   : > { %1734 = vmatpush3.bf16.msra.mxu1 %v1731_v42 }
 0x15b   : > { %1757 = vmatprep.subr.bf16.mxu1 %v1991_v27 }
 0x15d   : > { %1632 = vmatmul.mubr.f32.vlgmr.msra.gmra.mrb[0].mxu1 %v659_v43 }
 0x15e   : > { %1634 = vmatprep.mubr.f32.mxu1 %v661_v44 }
 0x161   : > { %1635 = vmatmul.mubr.f32.gmra.mrb[2].mxu1 %v663_v45 }
 0x162   : > { %1637 = vmatprep.mubr.f32.mxu1 %v665_v46 }
 0x165   : > { %1638 = vmatmul.mubr.f32.gmra.mrb[4].mxu1 %v667_v47 }
 0x166   : > { %1640 = vmatprep.mubr.f32.mxu1 %v669_v48 }
 0x169   : > { %1641 = vmatmul.mubr.f32.gmra.mrb[6].mxu1 %v671_v49 }
 0x16a   : > { %1680 = vmatprep.mubr.msk.f32.mxu1 %vm1992_vm2, %v1993_v29 }
 0x1c0   : > { %v833_v33 = vpop.permute.xlu1 %832 }
 0x1c1   : > { %v838_v35 = vpop.permute.xlu0 %837 }
 0x1c4   : > { %v843_v34 = vpop.permute.xlu1 %842 }
 0x1c8   : > { %v848_v41 = vpop.permute.xlu1 %847 }
 0x230   : > { %v1633_v58 = vpop.f32.mrb[0].mxu1 }
 0x231   : > { %v785_v60 = vadd.f32 %v1633_v58, %v681_v56  ;;  %v779_v61 = vpop.f32.mrb[1].mxu1 }
 0x232   : > { %v780_v62 = vadd.f32 %v779_v61, %v676_v55  ;;  %v952_v55 = vpop.permute.xlu0 %951  ;;  %v1060_v61 = vpop.permute.xlu1 %1059 }
 0x233   : > { %v819_v63 = vmax.f32 %v785_v60, 0.0  ;;  %v1031_v60 = vand.u32 127, %v954_v52 }
 0x234   : > { %v818_v1 = vmax.f32 %v780_v62, 0.0  ;;  %v1636_v2 = vpop.f32.mrb[2].mxu1 }
 0x235   : > { %v795_v3 = vadd.f32 %v1636_v2, %v691_v57  ;;  %v789_v0 = vpop.f32.mrb[3].mxu1  ;;  %v1036_v62 = vand.u32 7, %v1031_v60 }
 0x236   : > { %v1735_v5 = vpack.c.bf16 %v819_v63, %v818_v1  ;;  %v790_v6 = vadd.f32 %v789_v0, %v686_v59  ;;  %v1069_v63 = vpop.permute.xlu1 %1068 }
 0x237   : > { %v821_v8 = vmax.f32 %v795_v3, 0.0  ;;  %vm1044_vm3 = vcmp.ne.s32.totalorder %v1036_v62, 0  ;;  %vm1047_vm4 = vcmp.ne.s32.totalorder %v1036_v62, 7 }
 0x238   : > { %v820_v9 = vmax.f32 %v790_v6, 0.0  ;;  %v1639_v26 = vpop.f32.mrb[4].mxu1  ;;  %1736 = vmatprep.subr.bf16.mxu0 %v1735_v5  ;;  %v1486_v1 = vsel %vm1044_vm3, 1.0, %v1993_v29  ;;  %v1487_v0 = vsel %vm1047_vm4, 1.0, %v1993_v29 }
 0x239   : > { %v805_v10 = vadd.f32 %v1639_v26, %v701_v4  ;;  %v799_v11 = vpop.f32.mrb[5].mxu1  ;;  %1738 = vmatpush3.bf16.msra.mxu0 %v1735_v5 }
 0x23a   : > { %v1739_v12 = vpack.c.bf16 %v821_v8, %v820_v9  ;;  %v800_v13 = vadd.f32 %v799_v11, %v696_v7  ;;  %v1079_v7 = vpop.permute.xlu0 %1078 }
 0x23b   : > { %v823_v14 = vmax.f32 %v805_v10, 0.0 }
 0x23c   : > { %v822_v16 = vmax.f32 %v800_v13, 0.0  ;;  %v1642_v17 = vpop.f32.mrb[6].mxu1  ;;  %1740 = vmatprep.subr.bf16.mxu0 %v1739_v12 }
 0x23d   : > { %v815_v19 = vadd.f32 %v1642_v17, %v711_v15  ;;  %v809_v20 = vpop.f32.mrb[7].mxu1  ;;  %1742 = vmatpush3.bf16.msra.mxu0 %v1739_v12  ;;  %v1104_v17 = vld [vmem:[%s2423_s6] sm:$0xff] }
 0x23e   : > { %v1743_v21 = vpack.c.bf16 %v823_v14, %v822_v16  ;;  %v810_v22 = vadd.f32 %v809_v20, %v706_v18  ;;  %v1999_v18 = vmov 12  }
 0x23f   : > { %v825_v23 = vmax.f32 %v815_v19, 0.0 }
 0x240   : > { %v824_v24 = vmax.f32 %v810_v22, 0.0  ;;  %1744 = vmatprep.subr.bf16.mxu0 %v1743_v21 }
 0x241   : > { %1746 = vmatpush3.bf16.msra.mxu0 %v1743_v21 }
 0x242   : > { %v1747_v25 = vpack.c.bf16 %v825_v23, %v824_v24 }
 0x244   : > { %1748 = vmatprep.subr.bf16.mxu0 %v1747_v25 }
 0x245   : > { %1750 = vmatpush3.bf16.msra.mxu0 %v1747_v25 }
 0x246   : > { %1751 = vmatprep.subr.bf16.mxu0 %v1991_v27 }
 0x248   : > { %1660 = vmatmul.mubr.msk.f32.vlgmr.msra.gmra.mrb[16].mxu0 %vm850_vm1, %v827_v51  ;;  %v1996_v51 = vmov 3  }
 0x249   : > { %1662 = vmatprep.mubr.msk.f32.mxu0 %vm850_vm1, %v828_v53  ;;  %1849 = vset.pattern.permute.xlu0 %v1996_v51  ;;  %v955_v53 = vshrl.u32 %v954_v52, 7 }
 0x24a   : > { %1088 = vperm.xlu0 %1849, %v1050_v30   ;;  %v2001_v30 = vmov 8  }
 0x24b   : > { %1851 = vset.pattern.permute.xlu1 %v2001_v30 }
 0x24c   : > { %1663 = vmatmul.mubr.msk.f32.gmra.mrb[18].mxu0 %vm850_vm1, %v829_v54  ;;  %v956_v54 = vsub.s32 0, %v955_v53 }
 0x24d   : > { %1673 = vmatprep.mubr.msk.f32.mxu0 %vm1992_vm2, %v1993_v29 }
 0x24e   : > { %v957_v56 = vrot.slane %v952_v55, %v956_v54  ;;  %1850 = vset.pattern.permute.xlu0 %v1999_v18 }
 0x24f   : > { %1107 = vperm.xlu0 %1850, %v1104_v17  }
 0x2c9   : > { %v1089_v13 = vpop.permute.xlu0 %1088 }
 0x2ce   : > { %v1108_v32 = vpop.permute.xlu0 %1107 }
 0x31b   : > { %v1661_v36 = vpop.f32.mrb[16].mxu0 }
 0x31c   : > { %v931_v37 = vadd.f32 %v1661_v36, %v838_v35  ;;  %v925_v38 = vpop.f32.mrb[17].mxu0  ;;  %v2002_v36 = vmov 16  }
 0x31d   : > { %v926_v39 = vadd.f32 %v925_v38, %v833_v33  ;;  %1852 = vset.pattern.permute.xlu0 %v2002_v36 }
 0x31e   : > { %v945_v40 = vmax.f32 %v931_v37, 0.0 }
 0x31f   : > { %v944_v42 = vmax.f32 %v926_v39, 0.0  ;;  %v1664_v43 = vpop.f32.mrb[18].mxu0 }
 0x320   : > { %v941_v44 = vadd.f32 %v1664_v43, %v848_v41  ;;  %v935_v45 = vpop.f32.mrb[19].mxu0 }
 0x321   : > { %v1752_v46 = vpack.c.bf16 %v945_v40, %v944_v42  ;;  %v936_v47 = vadd.f32 %v935_v45, %v843_v34 }
 0x322   : > { %v947_v48 = vmax.f32 %v941_v44, 0.0 }
 0x323   : > { %v946_v49 = vmax.f32 %v936_v47, 0.0  ;;  %1753 = vmatpush3.bf16.msra.mxu0 %v1752_v46 }
 0x324   : > { %1754 = vmatprep.subr.bf16.mxu0 %v1991_v27 }
 0x325   : > { %v1755_v50 = vpack.c.bf16 %v947_v48, %v946_v49 }
 0x327   : > { %1756 = vmatpush3.bf16.msra.mxu0 %v1755_v50 }
 0x32a   : > { %1674 = vmatmul.mubr.msk.f32.vlgmr.msra.gmra.mrb[20].mxu0 %vm463_vm0, %v948_v28  ;;  %v1187_v28 = vld [vmem:[%s2424_s7] sm:$0xff] }
 0x32b   : > { %1685 = vmatprep.mubr.msk.f32.mxu0 %vm1199_vm9, %v1187_v28 }
 0x3fd   : > { %v1026_v57 = vpop.f32.mrb[20].mxu0 }
 0x3fe   : > { %v1027_v58 = vadd.f32 %v1026_v57, %v957_v56  ;;  %v1675_v59 = vpop.f32.mrb[21].mxu0 }
 0x400   : > { %1051 = vrot.lane.b32.xlu1 %v1027_v58, %s1997_s27  ;;  %v1074_v4 = vrot.slane %v1027_v58, %v956_v54 }
 0x402   : > { %v1075_v26 = vmul.f32 %v1074_v4, %v1069_v63 }
 0x404   : > { %1054 = vrot.lane.b32.xlu1 %v1027_v58, %s1998_s22 }
 0x472   : > { %v1052_v2 = vpop.permute.xlu1 %1051 }
 0x473   : > { %v1053_v3 = vmul.f32 %v1486_v1, %v1052_v2 }
 0x475   : > { %v1065_v5 = vrot.slane %v1053_v3, %v956_v54 }
 0x476   : > { %v1055_v6 = vpop.permute.xlu1 %1054 }
 0x477   : > { %v1066_v8 = vmul.f32 %v1065_v5, %v1060_v61  ;;  %v1056_v9 = vmul.f32 %v1487_v0, %v1055_v6 }
 0x479   : > { %v1084_v10 = vrot.slane %v1056_v9, %v956_v54  ;;  %v1076_v12 = vadd.f32 %v1075_v26, %v1066_v8 }
 0x47b   : > { %v1085_v11 = vmul.f32 %v1084_v10, %v1079_v7 }
 0x47d   : > { %v1086_v14 = vadd.f32 %v1085_v11, %v1076_v12 }
 0x47f   : > { %v1091_v15 = vadd.f32 %v1089_v13, %v1086_v14 }
 0x481   : > { %v1092_v16 = vmax.f32 %v1091_v15, 0.0 }
 0x483   : > { %1093 = vrot.lane.b32.xlu1 %v1092_v16, %s1997_s27  ;;  %v1100_v21 = vrot.slane %v1092_v16, 4 }
 0x487   : > { %1096 = vrot.lane.b32.xlu1 %v1092_v16, %s1998_s22  ;;  %s2373_s22 = scalar_lea.hbm %s2426_s9, %s1494_s25 }
 0x48b   : > { %1191 = vperm.xlu1 %1851, %v1187_v28  }
 0x48f   : > { %1196 = vperm.xlu1 %1851, %v1188_v31  }
 0x4f5   : > { %v1094_v19 = vpop.permute.xlu1 %1093 }
 0x4f6   : > { %v1095_v20 = vmul.f32 %v1486_v1, %v1094_v19 }
 0x4f8   : > { %v1103_v24 = vsel %vm1102_vm5, %v1095_v20, %v1100_v21 }
 0x4f9   : > { %v1097_v22 = vpop.permute.xlu1 %1096 }
 0x4fa   : > { %v1098_v23 = vmul.f32 %v1487_v0, %v1097_v22 }
 0x4fc   : > { %v1758_v25 = vpack.c.bf16 %v1098_v23, %v1103_v24 }
 0x4fe   : > { %1760 = vmatpush3.bf16.msk.msra.mxu1 %vm1759_vm7, %v1758_v25 }
 0x4ff   : > { %1761 = vmatprep.subr.bf16.mxu1 %v1991_v27 }
 0x501   : > { %1681 = vmatmul.mubr.msk.f32.vlgmr.msra.gmra.mrb[8].mxu1 %vm1110_vm8, %v1104_v17 }
 0x502   : > { %1692 = vmatprep.mubr.msk.f32.mxu1 %vm1992_vm2, %v1993_v29  ;;  %v1281_v29 = vld [vmem:[%s2425_s8] sm:$0xf] }
 0x503   : > { %1284 = vperm.xlu0 %1852, %v1281_v29  }
 0x50a   : > { %v1192_v37 = vpop.permute.xlu1 %1191 }
 0x50e   : > { %v1197_v39 = vpop.permute.xlu1 %1196 }
 0x582   : > { %v1285_v46 = vpop.permute.xlu0 %1284 }
 0x5d4   : > { %v1182_v27 = vpop.f32.mrb[8].mxu1 }
 0x5d5   : > { %v1183_v33 = vadd.f32 %v1182_v27, %v1108_v32  ;;  %v1682_v34 = vpop.f32.mrb[9].mxu1 }
 0x5d7   : > { %v1186_v35 = vmax.f32 %v1183_v33, 0.0 }
 0x5d9   : > { %1683 = vmatprep.subr.mxu0 %v1186_v35 }
 0x5da   : > { %1684 = vmatpush3.msra.mxu0 %v1186_v35 }
 0x5db   : > { %1686 = vmatmul.mubr.msk.f32.vlgmr.msra.gmra.mrb[22].mxu0 %vm1199_vm9, %v1188_v31 }
 0x6ae   : > { %v1687_v38 = vpop.f32.mrb[22].mxu0 }
 0x6af   : > { %v1276_v40 = vadd.f32 %v1687_v38, %v1197_v39  ;;  %v1270_v41 = vpop.f32.mrb[23].mxu0 }
 0x6b0   : > { %v1271_v42 = vadd.f32 %v1270_v41, %v1192_v37 }
 0x6b1   : > { %v1280_v43 = vmax.f32 %v1276_v40, 0.0 }
 0x6b2   : > { %v1279_v44 = vmax.f32 %v1271_v42, 0.0 }
 0x6b4   : > { %v1762_v45 = vpack.c.bf16 %v1280_v43, %v1279_v44 }
 0x6b6   : > { %1763 = vmatpush3.bf16.msra.mxu1 %v1762_v45 }
 0x6b9   : > { %1693 = vmatmul.mubr.msk.f32.vlgmr.msra.gmra.mrb[10].mxu1 %vm1287_vm10, %v1281_v29 }
 0x78c   : > { %v1356_v47 = vpop.f32.mrb[10].mxu1 }
 0x78d   : > { %v1357_v48 = vadd.f32 %v1356_v47, %v1285_v46  ;;  %v1694_v49 = vpop.f32.mrb[11].mxu1 }
 0x78f   : > { %1360 = vst [vmem:[%s362_s29] sm:$0xf] %v1357_v48 }
 0x790   : > { %1924 = shalt.err (!%p1921_p13)
}
 0x791   : > { %s1925_s18 = scalar_lea.hbm %s2373_s22, 64  ;;  %s1929_s17 = scalar_lea.hbm %s2426_s9, 128 }
 0x792   : > { %p1926_p7 = scmp.ne.s32.totalorder %s2373_s22, %s1925_s18  ;;  %p1930_p1 = scmp.lt.u32.totalorder %s2373_s22, %s2426_s9 }
 0x793   : > { %p1931_p8 = scmp.lt.u32.totalorder %s1929_s17, %s1925_s18  ;;  %p1933_p9 = scmp.lt.u32.totalorder %s1925_s18, %s2373_s22 }
 0x794   : > { %p1927_p3 = pnand %p1926_p7, %p2453_p10 }
 0x795   : > { %p1932_p11 = por %p1931_p8, %p1930_p1 }
 0x796   : > { %p1928_p12 = pneg %p1927_p3 }
 0x797   : > { %p1934_p2 = por %p1933_p9, %p1932_p11 }
 0x799   : > { %p1935_p4 = pnand %p1934_p2, %p1928_p12 }
 0x79b   : > { %1938 = shalt.err (!%p1935_p4)
}
 0x79c   : > { %1770 = dma.vmem_to_hbm [thread:$0]  (%p2453_p10), %s2375_s14, 64, %s2373_s22, %s1362_s20  }
 0x79d PF: > { %s2454_s25 = sld [smem:[#allocation14_spill]]  ;;  %s1387_s29 = sand.u32 1, %s1969_s30  }
 0x79e   : > { %p2456_p0 = scmp.ge.s32.totalorder %s1981_s12, 2  ;;  %s1388_s11 = scalar_lea.sflag [#allocation4], %s1387_s29 }
 0x7a3   : > { %p2455_p5 = scmp.ne.s32.totalorder %s2454_s25, 0 }
 0x7a5   : > { %p1781_p6 = pnand %p2456_p0, %p2455_p5 }
 0x7a7   : > { %1964 = dma.done.wait (!%p1781_p6), %s1388_s11, 64  }
 0x7a8   : > { %1966 = vsyncadd (!%p1781_p6), %s1388_s11, 4294967232  ;;  %s2457_s12 = sld [smem:[#allocation12_spill]]  ;;  %s2458_s27 = sld [smem:[#allocation11_spill]] }
 0x7a9   : > { %s2459_s11 = sld [smem:[#allocation13_spill]]  ;;  %s2460_s30 = smov %s1973_s10 }
 0x7ae   : > { %p23_p13 = scmp.ge.s32.totalorder %s2457_s12, 4   ;;  %s2461_s10 = smov %s2458_s27 }
 0x7b0   :  { %25 = sbr.rel (!%p23_p13) target bundleno = 6 (0x6), region = 105 }
 0x7b7   :  { %1393 = vsyncpa [#allocation3], 1 }
 0x7b8   :  { %1395 = vsyncpa [#allocation3 + $0x1], 1 }
 0x7b9   :  { %1396 = vsyncpa [#allocation6], 1 }
 0x7ba   :  { %1397 = vsyncpa [#allocation4], 1 }
 0x7bb   :  { %1399 = vsyncpa [#allocation4 + $0x1], 1 }

</bundles_post_ra>
